<compile_context>
chip_gen: v5e
topology: v5e:2x2
jax: 0.10.0
libtpu: 0.0.40
codegen_flags: <defaults>
</compile_context>

<pallas_src>
import math

import jax
import jax.numpy as jnp
from jax.experimental import pallas as pl
from jax.experimental.pallas import tpu as pltpu


# ----------------------------------------------------------------------------
# helpers
# ----------------------------------------------------------------------------
def _round_up(x, m):
    return (x + m - 1) // m * m


def _vmem_limit(block_bytes):
    """Scoped-VMEM request: double-buffered blocks + headroom, v7x-safe cap."""
    return int(min(48 << 20, max(8 << 20, 2 * block_bytes + (4 << 20))))


def fold_bn(gamma, beta, mean, var, eps=1e-5):
    scale = gamma / jnp.sqrt(var + eps)
    bias = beta - mean * scale
    return scale, bias


# ----------------------------------------------------------------------------
# Pallas kernels
# ----------------------------------------------------------------------------
def _make_mm_kernel(*, relu: bool, has_res: bool):
    """o = post(A @ B + bias): bf16 operands, f32 MXU accum, single K step."""

    def kernel(*refs):
        if has_res:
            a_ref, b_ref, c_ref, r_ref, o_ref = refs
        else:
            a_ref, b_ref, c_ref, o_ref = refs
            r_ref = None
        y = jnp.dot(a_ref[...], b_ref[...], preferred_element_type=jnp.float32)
        y = y + c_ref[...]
        if has_res:
            y = y + r_ref[...].astype(jnp.float32)
        if relu:
            y = jnp.maximum(y, 0.0)
        o_ref[...] = y.astype(o_ref.dtype)

    return kernel


def _make_conv3x3_kernel(kh, kw, Ho, Wo, *, relu: bool, has_res: bool):
    """Direct 3x3/stride-1 conv: padded NHWC activation resident in VMEM,
    kh*kw taps folded into the in-kernel reduction (no im2col in HBM)."""

    def kernel(*refs):
        if has_res:
            x_ref, w_ref, c_ref, r_ref, o_ref = refs
        else:
            x_ref, w_ref, c_ref, o_ref = refs
            r_ref = None
        n, cin = x_ref.shape[0], x_ref.shape[3]
        tn = o_ref.shape[1]
        m = n * Ho * Wo
        acc = jnp.zeros((m, tn), jnp.float32)
        for a in range(kh):
            for b in range(kw):
                xs = x_ref[:, a:a + Ho, b:b + Wo, :]        # (n, Ho, Wo, cin)
                # f32 detour keeps the (n,Ho,Wo,cin)->(m,cin) collapse on
                # native (8,128) tiles regardless of Wo's bf16 alignment.
                xs = (xs.astype(jnp.float32)
                        .reshape(m, cin)
                        .astype(jnp.bfloat16))
                acc = acc + jnp.dot(xs, w_ref[a * kw + b],
                                    preferred_element_type=jnp.float32)
        y = acc + c_ref[...]
        if has_res:
            y = y + r_ref[...].astype(jnp.float32)
        if relu:
            y = jnp.maximum(y, 0.0)
        o_ref[...] = y.astype(o_ref.dtype)

    return kernel


def _maxpool_kernel(x_ref, o_ref):
    """3x3 stride-2 max pool of one image from its 2x2 phase decomposition.

    x_ref: (4, Hq, Wq, C) with phase [2a+b][qh,qw] = xpad[2qh+a, 2qw+b]
    o_ref: (1, Ho, Wo, C)
    """
    Ho, Wo = o_ref.shape[1], o_ref.shape[2]
    taps = ((0, 0), (1, 0), (0, 1))          # (phase bit, +index offset)
    m = None
    for a, da in taps:
        for b, db in taps:
            v = x_ref[2 * a + b, da:da + Ho, db:db + Wo, :]
            m = v if m is None else jnp.maximum(m, v)
    o_ref[0] = m


def _head_kernel(x_ref, w_ref, b_ref, o_ref):
    """Fused global-average-pool + FC head."""
    feat = jnp.mean(x_ref[...].astype(jnp.float32), axis=1)          # (N, C)
    o_ref[...] = (jnp.dot(feat.astype(jnp.bfloat16), w_ref[...],
                          preferred_element_type=jnp.float32) + b_ref[...])


# ----------------------------------------------------------------------------
# wrappers around pallas_call
# ----------------------------------------------------------------------------
def fused_matmul(a, b, bias, *, relu, residual=None, out_dtype=jnp.bfloat16):
    """post(a @ b + bias): a (M,K) bf16, b (K,N) bf16 (BN scale pre-folded),
    bias (1,N) f32.  Single reduction step, lane-dense output (N % 128 == 0)."""
    M, K = a.shape
    Kb, N = b.shape
    assert K == Kb and N % 128 == 0, (a.shape, b.shape)

    tn = 128
    if M % 8 != 0:
        tm = M                                # full-dim block (tiny M)
    else:
        tm = min(256, M)
        while M % tm != 0:
            tm //= 2
        # >= 4 blocks where possible: both TensorCores busy + pipelining (v7x)
        while (M // tm) * (N // tn) < 4 and tm % 16 == 0:
            tm //= 2

    has_res = residual is not None
    inputs = [a, b, bias]
    in_specs = [
        pl.BlockSpec((tm, K), lambda j, i: (i, 0)),
        pl.BlockSpec((K, tn), lambda j, i: (0, j)),
        pl.BlockSpec((1, tn), lambda j, i: (0, j)),
    ]
    if has_res:
        inputs.append(residual)
        in_specs.append(pl.BlockSpec((tm, tn), lambda j, i: (i, j)))

    blk_bytes = 2 * (tm * K + K * tn + tm * tn * (2 if has_res else 1)) + 4 * tn
    out = pl.pallas_call(
        _make_mm_kernel(relu=relu, has_res=has_res),
        out_shape=jax.ShapeDtypeStruct((M, N), out_dtype),
        grid=(N // tn, M // tm),               # weight block on the slow axis
        in_specs=in_specs,
        out_specs=pl.BlockSpec((tm, tn), lambda j, i: (i, j)),
        compiler_params=pltpu.CompilerParams(
            dimension_semantics=("parallel", "parallel"),
            vmem_limit_bytes=_vmem_limit(blk_bytes)),
        cost_estimate=pl.CostEstimate(
            flops=2 * M * K * N, transcendentals=0,
            bytes_accessed=int(2 * (M * K + K * N + M * N))),
    )(*inputs)
    return out


def im2col(x, kh, kw, stride, pad):
    """NHWC -> (N*Ho*Wo, kh*kw*C) patch matrix (JAX glue; keeps x.dtype=bf16).

    Only used for the stem, the stride-2 convs and small unaligned layers."""
    N, H, W, C = x.shape
    Ho = (H + 2 * pad - kh) // stride + 1
    Wo = (W + 2 * pad - kw) // stride + 1
    xp = x if pad == 0 else jnp.pad(x, ((0, 0), (pad, pad), (pad, pad), (0, 0)))
    cols = []
    for i in range(kh):
        for j in range(kw):
            v = xp[:, i:i + stride * (Ho - 1) + 1:stride,
                      j:j + stride * (Wo - 1) + 1:stride, :]
            cols.append(v)
    patches = jnp.stack(cols, axis=3)                  # (N, Ho, Wo, kh*kw, C)
    return patches.reshape(N * Ho * Wo, kh * kw * C), (N, Ho, Wo)


def conv3x3_s1_direct(x, p, *, relu, residual=None):
    """3x3/s1/p1 conv with the 9 taps folded into the kernel reduction."""
    N, H, W, C = x.shape
    kh, kw, cout = p["kh"], p["kw"], p["cout"]
    Ho, Wo = H, W
    M = N * Ho * Wo
    xp = jnp.pad(x, ((0, 0), (1, 1), (1, 1), (0, 0)))
    tn = 128
    nj = cout // tn
    has_res = residual is not None

    inputs = [xp, p["w"], p["bias"]]
    in_specs = [
        pl.BlockSpec((N, H + 2, W + 2, C), lambda j: (0, 0, 0, 0)),
        pl.BlockSpec((kh * kw, C, tn), lambda j: (0, 0, j)),
        pl.BlockSpec((1, tn), lambda j: (0, j)),
    ]
    if has_res:
        inputs.append(residual.reshape(M, cout))
        in_specs.append(pl.BlockSpec((M, tn), lambda j: (0, j)))

    blk_bytes = (2 * xp.size + 2 * kh * kw * C * tn + 4 * tn
                 + 2 * M * tn * (2 if has_res else 1) + 4 * M * tn)
    out = pl.pallas_call(
        _make_conv3x3_kernel(kh, kw, Ho, Wo, relu=relu, has_res=has_res),
        out_shape=jax.ShapeDtypeStruct((M, cout), jnp.bfloat16),
        grid=(nj,),
        in_specs=in_specs,
        out_specs=pl.BlockSpec((M, tn), lambda j: (0, j)),
        compiler_params=pltpu.CompilerParams(
            dimension_semantics=("parallel",),
            vmem_limit_bytes=_vmem_limit(blk_bytes)),
        cost_estimate=pl.CostEstimate(
            flops=2 * M * kh * kw * C * cout, transcendentals=0,
            bytes_accessed=int(2 * (xp.size + p["w"].size + M * cout))),
    )(*inputs)
    return out.reshape(N, Ho, Wo, cout)


def conv_bn_act(x, p, *, stride, pad, relu, residual=None):
    """conv2d (NHWC, packed weight with BN scale folded) + f32 bias
    (+ residual)(+ReLU).  Uses the direct-conv kernel when the layout allows,
    otherwise falls back to im2col + fused matmul."""
    kh, kw, cout = p["kh"], p["kw"], p["cout"]
    N, H, W, C = x.shape
    assert C == p["w"].shape[1], (x.shape, p["w"].shape)
    if (kh == 3 and kw == 3 and stride == 1 and pad == 1
            and W % 8 == 0 and C % 8 == 0 and cout % 128 == 0):
        return conv3x3_s1_direct(x, p, relu=relu, residual=residual)
    cols, (N, Ho, Wo) = im2col(x, kh, kw, stride, pad)
    res2d = (residual.reshape(N * Ho * Wo, cout)
             if residual is not None else None)
    y = fused_matmul(cols, p["w"].reshape(-1, cout), p["bias"],
                     relu=relu, residual=res2d)
    return y.reshape(N, Ho, Wo, cout)


def maxpool2d(x, k=3, stride=2, pad=1):
    """3x3/stride-2 max pool: 2x2 phase decomposition + tiled per-image kernel."""
    assert k == 3 and stride == 2
    N, H, W, C = x.shape
    Ho = (H + 2 * pad - k) // stride + 1
    Wo = (W + 2 * pad - k) // stride + 1
    Hp = _round_up(H + 2 * pad, 2)
    Wp = _round_up(W + 2 * pad, 2)
    xp = jnp.pad(x, ((0, 0), (pad, Hp - H - pad), (pad, Wp - W - pad), (0, 0)),
                 constant_values=-jnp.inf)
    Hq, Wq = Hp // 2, Wp // 2
    assert Ho + 1 <= Hq and Wo + 1 <= Wq
    xq = (xp.reshape(N, Hq, 2, Wq, 2, C)
            .transpose(0, 2, 4, 1, 3, 5)
            .reshape(N * 4, Hq, Wq, C))
    return pl.pallas_call(
        _maxpool_kernel,
        out_shape=jax.ShapeDtypeStruct((N, Ho, Wo, C), x.dtype),
        grid=(N,),
        in_specs=[pl.BlockSpec((4, Hq, Wq, C), lambda n: (n, 0, 0, 0))],
        out_specs=pl.BlockSpec((1, Ho, Wo, C), lambda n: (n, 0, 0, 0)),
        compiler_params=pltpu.CompilerParams(
            dimension_semantics=("parallel",)),
    )(xq)


def head_avgpool_fc(x, w, b):
    """Fused global-average-pool + FC head (tiny M: one un-gridded block)."""
    N, H, W, C = x.shape
    ncp = w.shape[1]
    xr = x.reshape(N, H * W, C)
    return pl.pallas_call(
        _head_kernel,
        out_shape=jax.ShapeDtypeStruct((N, ncp), jnp.float32),
        grid=(1,),
        in_specs=[pl.BlockSpec((N, H * W, C), lambda i: (0, 0, 0)),
                  pl.BlockSpec((C, ncp), lambda i: (0, 0)),
                  pl.BlockSpec((1, ncp), lambda i: (0, 0))],
        out_specs=pl.BlockSpec((N, ncp), lambda i: (0, 0)),
    )(xr, w, b)


# ----------------------------------------------------------------------------
# ResNet34 parameters (deterministic synthetic init, pre-packed) and forward
# ----------------------------------------------------------------------------
class KeyGen:
    def __init__(self, seed=0):
        self.key = jax.random.PRNGKey(seed)

    def __call__(self):
        self.key, sub = jax.random.split(self.key)
        return sub


def make_resnet34_params(num_classes=250, seed=0):
    kg = KeyGen(seed)

    def conv_w(cout, cin, kh, kw):
        fan_in = cin * kh * kw
        return (jax.random.normal(kg(), (cout, cin, kh, kw), jnp.float32)
                / math.sqrt(fan_in))

    def bn(c):
        gamma = 1.0 + 0.05 * jax.random.normal(kg(), (c,), jnp.float32)
        beta = 0.05 * jax.random.normal(kg(), (c,), jnp.float32)
        mean = 0.05 * jax.random.normal(kg(), (c,), jnp.float32)
        var = 1.0 + 0.05 * jnp.abs(jax.random.normal(kg(), (c,), jnp.float32))
        return (gamma, beta, mean, var)

    def pack(w, bn_p, cin_pad=None, cout_pad=None):
        # (cout,cin,kh,kw) -> (kh*kw, cin_p, cout_p) bf16 with the BN scale
        # folded into the weights; f32 bias kept separately.  Zero padding on
        # cin/cout keeps every activation lane-dense (channels % 128 == 0).
        cout, cin, kh, kw = w.shape
        scale, bias = fold_bn(*bn_p)
        w = w * scale[:, None, None, None]
        wt = jnp.transpose(w, (2, 3, 1, 0)).reshape(kh * kw, cin, cout)
        cin_p = cin if cin_pad is None else cin_pad
        cout_p = cout if cout_pad is None else cout_pad
        wt = jnp.pad(wt, ((0, 0), (0, cin_p - cin), (0, cout_p - cout)))
        bias_p = jnp.pad(bias, (0, cout_p - cout))
        return {"w": wt.astype(jnp.bfloat16),
                "bias": bias_p.reshape(1, cout_p).astype(jnp.float32),
                "kh": kh, "kw": kw, "cout": cout_p}

    def cpad(c):
        return _round_up(max(c, 128), 128)

    # Stem: image channels padded 3 -> 8 (K = 49*8 = 392, sublane aligned),
    # output channels padded 64 -> 128 (lane-dense stores downstream).
    params = {"stem": pack(conv_w(64, 3, 7, 7), bn(64), cin_pad=8,
                           cout_pad=128)}
    layer_cfg = [(64, 3, 1), (128, 4, 2), (256, 6, 2), (512, 3, 2)]
    in_real, in_buf = 64, 128
    layers = []
    for out_c, nblocks, stride in layer_cfg:
        out_buf = cpad(out_c)
        blocks = []
        for bi in range(nblocks):
            s = stride if bi == 0 else 1
            blk = {"conv1": pack(conv_w(out_c, in_real, 3, 3), bn(out_c),
                                 cin_pad=in_buf, cout_pad=out_buf),
                   "conv2": pack(conv_w(out_c, out_c, 3, 3), bn(out_c),
                                 cin_pad=out_buf, cout_pad=out_buf),
                   "stride": s}
            if s != 1 or in_real != out_c:
                blk["down"] = pack(conv_w(out_c, in_real, 1, 1), bn(out_c),
                                   cin_pad=in_buf, cout_pad=out_buf)
            blocks.append(blk)
            in_real, in_buf = out_c, out_buf
        layers.append(blocks)
    params["layers"] = layers

    ncp = _round_up(num_classes, 128)
    fc_w = (jax.random.normal(kg(), (num_classes, 512), jnp.float32)
            / math.sqrt(512))
    fc_b = 0.01 * jax.random.normal(kg(), (num_classes,), jnp.float32)
    params["fc_w"] = jnp.pad(fc_w.T, ((0, 0), (0, ncp - num_classes))
                             ).astype(jnp.bfloat16)
    params["fc_b"] = (jnp.pad(fc_b, (0, ncp - num_classes))
                      .reshape(1, ncp).astype(jnp.float32))
    params["num_classes"] = num_classes
    return params


def basic_block(x, blk):
    s = blk["stride"]
    identity = x
    out = conv_bn_act(x, blk["conv1"], stride=s, pad=1, relu=True)
    if "down" in blk:
        identity = conv_bn_act(x, blk["down"], stride=s, pad=0, relu=False)
    # relu(bn2(conv2(out)) + identity): residual + relu fused in the kernel
    return conv_bn_act(out, blk["conv2"], stride=1, pad=1, relu=True,
                       residual=identity)


def resnet34_forward(params, x_nchw):
    """Equivalent of ResNet34.forward(x): eval-mode backbone, fc->num_classes."""
    x = jnp.transpose(x_nchw, (0, 2, 3, 1)).astype(jnp.bfloat16)   # NCHW->NHWC
    x = jnp.pad(x, ((0, 0), (0, 0), (0, 0), (0, 8 - x.shape[3])))  # 3 -> 8 ch
    x = conv_bn_act(x, params["stem"], stride=2, pad=3, relu=True)
    x = maxpool2d(x, k=3, stride=2, pad=1)
    for blocks in params["layers"]:
        for blk in blocks:
            x = basic_block(x, blk)
    logits = head_avgpool_fc(x, params["fc_w"], params["fc_b"])     # (N, ncp)
    return logits[:, :params["num_classes"]]                        # (N, 250)


# ----------------------------------------------------------------------------
if __name__ == "__main__":
    key = jax.random.PRNGKey(0)
    # batch=2, 3 channels (ResNet stem requires 3), 64x64 spatial so the
    # deepest stage still has a 2x2 map for the global-avg-pool reduction.
    x = jax.random.normal(key, (2, 3, 64, 64), jnp.float32)          # NCHW
    params = make_resnet34_params(num_classes=250, seed=0)

    logits = resnet34_forward(params, x)
    jax.block_until_ready(logits)

    assert logits.shape == (2, 250), logits.shape
    assert bool(jnp.all(jnp.isfinite(logits)))
    print("KERNEL_OK")
</pallas_src>

<mosaic_0001>
module attributes {stable_mosaic.version = 11 : i64} {
  func.func @kernel(%arg0: i32, %arg1: i32, %arg2: memref<256x392xbf16, #tpu.memory_space<vmem>>, %arg3: memref<392x128xbf16, #tpu.memory_space<vmem>>, %arg4: memref<1x128xf32, #tpu.memory_space<vmem>>, %arg5: memref<256x128xbf16, #tpu.memory_space<vmem>>) attributes {dimension_semantics = [#tpu.dimension_semantics<parallel>, #tpu.dimension_semantics<parallel>], iteration_bounds = array<i64: 1, 8>, scalar_prefetch = 0 : i64, scratch_operands = 0 : i64, tpu.core_type = #tpu.core_type<tc>, window_params = [{transform_indices = @transform_0, window_bounds = array<i64: 256, 392>}, {transform_indices = @transform_1, window_bounds = array<i64: 392, 128>}, {transform_indices = @transform_2, window_bounds = array<i64: 1, 128>}, {transform_indices = @transform_3, window_bounds = array<i64: 256, 128>}]} {
    %c0 = arith.constant 0 : index
    %c0_0 = arith.constant 0 : index
    %0 = vector.load %arg2[%c0, %c0_0] : memref<256x392xbf16, #tpu.memory_space<vmem>>, vector<256x392xbf16>
    %c0_1 = arith.constant 0 : index
    %c0_2 = arith.constant 0 : index
    %1 = vector.load %arg3[%c0_1, %c0_2] : memref<392x128xbf16, #tpu.memory_space<vmem>>, vector<392x128xbf16>
    %cst = arith.constant dense<0.000000e+00> : vector<256x128xf32>
    %2 = tpu.matmul %0, %1, %cst {dimension_numbers = #tpu.dot_dimension_numbers<[1], [0], [0], [1], [0, 0, 1, 1], [], []>} : vector<256x392xbf16>, vector<392x128xbf16>, vector<256x128xf32> -> vector<256x128xf32>
    %c0_3 = arith.constant 0 : index
    %c0_4 = arith.constant 0 : index
    %3 = vector.load %arg4[%c0_3, %c0_4] : memref<1x128xf32, #tpu.memory_space<vmem>>, vector<1x128xf32>
    %4 = vector.broadcast %3 : vector<1x128xf32> to vector<256x128xf32>
    %5 = arith.addf %2, %4 : vector<256x128xf32>
    %cst_5 = arith.constant 0.000000e+00 : f32
    %6 = vector.broadcast %cst_5 : f32 to vector<256x128xf32>
    %7 = arith.maximumf %5, %6 : vector<256x128xf32>
    %8 = arith.truncf %7 : vector<256x128xf32> to vector<256x128xbf16>
    %c0_6 = arith.constant 0 : index
    %c0_7 = arith.constant 0 : index
    %9 = vector.load %arg5[%c0_6, %c0_7] : memref<256x128xbf16, #tpu.memory_space<vmem>>, vector<256x128xbf16>
    tpu.vector_store %arg5[%c0_6, %c0_7], %8 {strides = array<i32>} : memref<256x128xbf16, #tpu.memory_space<vmem>>, vector<256x128xbf16>,
    return
  }
  func.func @transform_0(%arg0: i32, %arg1: i32) -> (i32, i32) {
    %c0_i32 = arith.constant 0 : i32
    %c0_i32_0 = arith.constant 0 : i32
    return %arg1, %c0_i32 : i32, i32
  }
  func.func @transform_1(%arg0: i32, %arg1: i32) -> (i32, i32) {
    %c0_i32 = arith.constant 0 : i32
    %c0_i32_0 = arith.constant 0 : i32
    return %c0_i32, %arg0 : i32, i32
  }
  func.func @transform_2(%arg0: i32, %arg1: i32) -> (i32, i32) {
    %c0_i32 = arith.constant 0 : i32
    %c0_i32_0 = arith.constant 0 : i32
    return %c0_i32, %arg0 : i32, i32
  }
  func.func @transform_3(%arg0: i32, %arg1: i32) -> (i32, i32) {
    %c0_i32 = arith.constant 0 : i32
    return %arg1, %arg0 : i32, i32
  }
}

</mosaic_0001>

<bundles_post_ra>
// kernel: tpu_custom_call.1
= control target key start
LH: loop header
LB: loop body
LE: loop exit
PB: predicated region body
PF: predicated region fallthrough
CT: control target
= control target key end

     0   :  { %8 = vsyncpa [#allocation3], 0  ;;  %s2516_s0 = inlined_call_operand.vmem [shape: bf16[2048,392], index: 0, kind: input, shape index: {}]   ;;  %s2517_s1 = inlined_call_operand.vmem [shape: bf16[392,128], index: 1, kind: input, shape index: {}]   ;;  %s2518_s2 = inlined_call_operand.vmem [shape: f32[1,128], index: 2, kind: input, shape index: {}]   ;;  %s2519_s3 = inlined_call_operand.hbm [shape: bf16[2048,128], index: 3, kind: output, shape index: {}]  }
   0x1   :  { %10 = vsyncpa [#allocation3 + $0x1], 0  ;;  %s2139_s12 = smov 0   ;;  %s2141_s13 = smov 0  }
   0x2   :  { %s2143_s14 = smov 0   ;;  %s2145_s15 = smov 0  }
   0x3   :  { %s2147_s16 = smov 0   ;;  %s2149_s17 = smov 0  }
   0x4 LB: > { %s1410_s18 = sadd.s32 4294967295, %s2115_s17   ;;  %s1411_s19 = sadd.s32 4294967294, %s2115_s17   ;;  %s2115_s17 = sphi %s2149_s17, %s16_s17   ;;  %s2111_s16 = sphi %s2147_s16, %s2526_s16   ;;  %s2107_s15 = sphi %s2145_s15, %s2525_s15   ;;  %s2103_s14 = sphi %s2143_s14, %s2524_s14   ;;  %s2099_s13 = sphi %s2141_s13, %s2523_s13   ;;  %s2095_s12 = sphi %s2139_s12, %s2522_s12  }
   0x5   : > { %s25_s20 = sadd.s32 1, %s2111_s16  ;;  %s115_s21 = sadd.s32 1, %s2103_s14 }
   0x6   : > { %p26_p0 = scmp.ge.s32.totalorder %s25_s20, 8  ;;  %p125_p1 = scmp.ne.s32.totalorder %s2103_s14, %s2099_s13 }
   0x7   : > { %p126_p2 = scmp.eq.s32.totalorder %s1410_s18, 7  ;;  %p131_p3 = scmp.ne.s32.totalorder %s2099_s13, %s2095_s12 }
   0x8   : > { %s2528_s20 = smov (%p26_p0, %s25_s20), 0  ;;  %p132_p5 = scmp.eq.s32.totalorder %s1411_s19, 7 }
   0x9   : > { %p2179_p4 = por %p126_p2, %p125_p1  ;;  %s110_s23 = ssub.s32 %s2111_s16, %s2528_s20 }
   0xa   : > { %p1416_p6 = scmp.ge.s32.totalorder %s2115_s17, 1  ;;  %p113_p7 = scmp.eq.s32.totalorder %s110_s23, 0 }
   0xb   : > { %p2186_p8 = por %p132_p5, %p131_p3  ;;  %p173_p9 = scmp.lt.s32.totalorder %s2115_s17, 9 }
   0xc   : > { %s2192_s25 = scalar_select %p113_p7, %s2103_s14, %s115_s21  }
   0xd   : > { %p174_p10 = pnand %p1416_p6, %p173_p9 }
   0xe   : > { %s1418_s5 = sshll.u32 (!%p174_p10), %s2107_s15, 5  ;;  %s202_s7 = sand.u32 (!%p174_p10), 1, %s2099_s13  }
   0xf   : > { %177 = sbr.rel (%p174_p10) target bundleno = 446 (0x1be), region = 32  ;;  %p206_p11 = scmp.lt.s32.totalorder (!%p174_p10), %s1418_s5, 255 }
  0x10   : > { %s1417_s8 = sshll.u32 (!%p174_p10), %s202_s7, 7  ;;  %s2057_s29 = scalar_lea.hbm (!%p174_p10), %s2519_s3, 1024 }
  0x11   : > { %s2379_s9 = scalar_lea.vmem (!%p174_p10), [#allocation2], %s1417_s8 }
  0x12   : > { %s1308_s19 = sshll.u32 (!%p174_p10), %s2379_s9, 4  ;;  %s1309_s19 = int_to_ptr.vmem [resolvable:$true] %s1308_s19 }
  0x14   : > { %v1866_v0 = vld [vmem:[%s2517_s1 + $0x38] sm:$0xff]  ;;  %v1865_v3 = vld [vmem:[%s2517_s1 + $0x30] sm:$0xff]  ;;  %s2530_s5 = smov (!%p206_p11, %s1418_s5), 255  ;;  %v1864_v6 = vld [vmem:[%s2517_s1 + $0x28] sm:$0xff]  ;;  %vm838_vm0 = vcmask 1043456   ;;  %vm789_vm1 = vcmask 64512  }
  0x15   : > { %v1874_v1 = vld [vmem:[%s2517_s1 + $0x78] sm:$0xff]  ;;  %842 = vmatpush.bf16.msra.mxu0 %v1866_v0  ;;  %v1873_v4 = vld [vmem:[%s2517_s1 + $0x70] sm:$0xff]  ;;  %s1794_s18 = sshll.u32 %s2530_s5, 4  ;;  %v1872_v7 = vld [vmem:[%s2517_s1 + $0x68] sm:$0xff] }
  0x16   : > { %v1882_v2 = vld [vmem:[%s2517_s1 + $0xb8] sm:$0xff]  ;;  %931 = vmatpush.bf16.msra.mxu1 %v1874_v1  ;;  %v1881_v5 = vld [vmem:[%s2517_s1 + $0xb0] sm:$0xff]  ;;  %v333_v8 = vld [vmem:[%s2517_s1 + $0xc0] sm:$0xf]  ;;  %s2225_s4 = scalar_lea.vmem %s2516_s0, %s1794_s18 }
  0x17   : > { %1020 = vmatpush.bf16.msra.mxu2 %v1882_v2  ;;  %v1880_v9 = vld [vmem:[%s2517_s1 + $0xa8] sm:$0xff]  ;;  %v739_v10 = vunpack.c.l.b16 %v333_v8  ;;  %v1433_v12 = vld [vmem:[%s2225_s4 + $0x18] sm:$0xf0]  ;;  %v1863_v14 = vld [vmem:[%s2517_s1 + $0x20] sm:$0xff] }
  0x18   : > { %v1796_v11 = vld [vmem:[%s2225_s4 + $0xc] sm:$0xf]  ;;  %v1871_v15 = vld [vmem:[%s2517_s1 + $0x60] sm:$0xff]  ;;  %v1862_v19 = vld [vmem:[%s2517_s1 + $0x18] sm:$0xff] }
  0x19   : > { %843 = vmatpush.bf16.msra.mxu0 %v1865_v3  ;;  %v764_v13 = vpack.c.b16 %v739_v10, %v739_v10  ;;  %v1879_v16 = vld [vmem:[%s2517_s1 + $0xa0] sm:$0xff]  ;;  %v1436_v18 = vor.u32 %v1796_v11, %v1433_v12  ;;  %v1870_v20 = vld [vmem:[%s2517_s1 + $0x58] sm:$0xff]  ;;  %v1861_v22 = vld [vmem:[%s2517_s1 + $0x10] sm:$0xff] }
  0x1a   : > { %932 = vmatpush.bf16.msra.mxu1 %v1873_v4  ;;  %v1878_v21 = vld [vmem:[%s2517_s1 + $0x98] sm:$0xff]  ;;  %v1869_v23 = vld [vmem:[%s2517_s1 + $0x50] sm:$0xff]  ;;  %v1860_v25 = vld [vmem:[%s2517_s1 + $0x8] sm:$0xff] }
  0x1b   : > { %1021 = vmatpush.bf16.msra.mxu2 %v1881_v5  ;;  %v840_v17 = vsel %vm838_vm0, %v764_v13, 0  ;;  %v1877_v24 = vld [vmem:[%s2517_s1 + $0x90] sm:$0xff]  ;;  %v1868_v26 = vld [vmem:[%s2517_s1 + $0x48] sm:$0xff]  ;;  %v1449_v29 = vld [vmem:[%s2225_s4 + $0x38] sm:$0xf0] }
  0x1c   : > { %1116 = vmatpush.bf16.msra.mxu3 %v840_v17  ;;  %v1876_v27 = vld [vmem:[%s2517_s1 + $0x88] sm:$0xff]  ;;  %v1859_v30 = vld [vmem:[%s2517_s1] sm:$0xff]  ;;  %v1797_v33 = vld [vmem:[%s2225_s4 + $0xc] sm:$0xf0] }
  0x1d   : > { %844 = vmatpush.bf16.msra.mxu0 %v1864_v6  ;;  %v1800_v28 = vld [vmem:[%s2225_s4 + $0x2c] sm:$0xf]  ;;  %v1867_v31 = vld [vmem:[%s2517_s1 + $0x40] sm:$0xff]  ;;  %v1425_v35 = vld [vmem:[%s2225_s4 + $0x10] sm:$0xf0] }
  0x1e   : > { %933 = vmatpush.bf16.msra.mxu1 %v1872_v7  ;;  %v1423_v32 = vld [vmem:[%s2225_s4] sm:$0xf]  ;;  %v1795_v34 = vld [vmem:[%s2225_s4 + $0x4] sm:$0xf]  ;;  %v1431_v37 = vld [vmem:[%s2225_s4 + $0x8] sm:$0xf]  ;;  %v1452_v39 = vor.u32 %v1800_v28, %v1449_v29 }
  0x1f   : > { %1022 = vmatpush.bf16.msra.mxu2 %v1880_v9  ;;  %1773 = vmatmul.msk.bf16.vlgmr.msra.gmra.mxu3 %vm789_vm1, %v1436_v18  ;;  %v1875_v36 = vld [vmem:[%s2517_s1 + $0x80] sm:$0xff]  ;;  %v1798_v38 = vld [vmem:[%s2225_s4 + $0x14] sm:$0xf0]  ;;  %v1424_v40 = vor.u32 %v1797_v33, %v1423_v32  ;;  %v1428_v41 = vor.u32 %v1795_v34, %v1425_v35  ;;  %v1804_v43 = vld [vmem:[%s2225_s4 + $0x4c] sm:$0xf] }
  0x20   : > { %v1432_v42 = vor.u32 %v1798_v38, %v1431_v37  ;;  %v1465_v44 = vld [vmem:[%s2225_s4 + $0x58] sm:$0xf0]  ;;  %v1439_v45 = vld [vmem:[%s2225_s4 + $0x20] sm:$0xf]  ;;  %v1801_v46 = vld [vmem:[%s2225_s4 + $0x2c] sm:$0xf0] }
  0x21   : > { %845 = vmatpush.bf16.msra.mxu0 %v1863_v14  ;;  %v1799_v47 = vld [vmem:[%s2225_s4 + $0x24] sm:$0xf]  ;;  %v1441_v48 = vld [vmem:[%s2225_s4 + $0x30] sm:$0xf0]  ;;  %v1447_v49 = vld [vmem:[%s2225_s4 + $0x28] sm:$0xf]  ;;  %v1468_v51 = vor.u32 %v1804_v43, %v1465_v44  ;;  %v1440_v52 = vor.u32 %v1801_v46, %v1439_v45 }
  0x22   : > { %934 = vmatpush.bf16.msra.mxu1 %v1871_v15  ;;  %v1802_v50 = vld [vmem:[%s2225_s4 + $0x34] sm:$0xf0]  ;;  %v1444_v53 = vor.u32 %v1799_v47, %v1441_v48  ;;  %v1808_v55 = vld [vmem:[%s2225_s4 + $0x6c] sm:$0xf]  ;;  %v1481_v56 = vld [vmem:[%s2225_s4 + $0x78] sm:$0xf0] }
  0x23   : > { %1023 = vmatpush.bf16.msra.mxu2 %v1879_v16  ;;  %v1448_v54 = vor.u32 %v1802_v50, %v1447_v49  ;;  %v1455_v57 = vld [vmem:[%s2225_s4 + $0x40] sm:$0xf]  ;;  %v1805_v58 = vld [vmem:[%s2225_s4 + $0x4c] sm:$0xf0]  ;;  %v1803_v59 = vld [vmem:[%s2225_s4 + $0x44] sm:$0xf]  ;;  %v1484_v63 = vor.u32 %v1808_v55, %v1481_v56 }
  0x24   : > { %v1457_v60 = vld [vmem:[%s2225_s4 + $0x50] sm:$0xf0]  ;;  %v1463_v61 = vld [vmem:[%s2225_s4 + $0x48] sm:$0xf]  ;;  %v1806_v62 = vld [vmem:[%s2225_s4 + $0x54] sm:$0xf0]  ;;  %v1456_v0 = vor.u32 %v1805_v58, %v1455_v57 }
  0x25   : > { %846 = vmatpush.bf16.msra.mxu0 %v1862_v19  ;;  %v1460_v1 = vor.u32 %v1803_v59, %v1457_v60  ;;  %v1464_v2 = vor.u32 %v1806_v62, %v1463_v61  ;;  %v1812_v3 = vld [vmem:[%s2225_s4 + $0x8c] sm:$0xf]  ;;  %v1497_v4 = vld [vmem:[%s2225_s4 + $0x98] sm:$0xf0]  ;;  %v1471_v5 = vld [vmem:[%s2225_s4 + $0x60] sm:$0xf] }
  0x26   : > { %935 = vmatpush.bf16.msra.mxu1 %v1870_v20  ;;  %v1809_v6 = vld [vmem:[%s2225_s4 + $0x6c] sm:$0xf0]  ;;  %v1807_v7 = vld [vmem:[%s2225_s4 + $0x64] sm:$0xf]  ;;  %v1473_v8 = vld [vmem:[%s2225_s4 + $0x70] sm:$0xf0]  ;;  %v1500_v11 = vor.u32 %v1812_v3, %v1497_v4 }
  0x27   : > { %1024 = vmatpush.bf16.msra.mxu2 %v1878_v21  ;;  %v1479_v9 = vld [vmem:[%s2225_s4 + $0x68] sm:$0xf]  ;;  %v1810_v10 = vld [vmem:[%s2225_s4 + $0x74] sm:$0xf0]  ;;  %v1472_v12 = vor.u32 %v1809_v6, %v1471_v5  ;;  %v1476_v13 = vor.u32 %v1807_v7, %v1473_v8  ;;  %v1816_v15 = vld [vmem:[%s2225_s4 + $0xac] sm:$0xf] }
  0x28   : > { %v1480_v14 = vor.u32 %v1810_v10, %v1479_v9  ;;  %v1513_v16 = vld [vmem:[%s2225_s4 + $0xb8] sm:$0xf0]  ;;  %v1487_v17 = vld [vmem:[%s2225_s4 + $0x80] sm:$0xf]  ;;  %v1813_v18 = vld [vmem:[%s2225_s4 + $0x8c] sm:$0xf0] }
  0x29   : > { %847 = vmatpush.bf16.msra.mxu0 %v1861_v22  ;;  %v1811_v19 = vld [vmem:[%s2225_s4 + $0x84] sm:$0xf]  ;;  %v1489_v20 = vld [vmem:[%s2225_s4 + $0x90] sm:$0xf0]  ;;  %v1495_v21 = vld [vmem:[%s2225_s4 + $0x88] sm:$0xf] }
  0x2a   : > { %936 = vmatpush.bf16.msra.mxu1 %v1869_v23  ;;  %v1814_v22 = vld [vmem:[%s2225_s4 + $0x94] sm:$0xf0]  ;;  %v1516_v23 = vor.u32 %v1816_v15, %v1513_v16  ;;  %v1529_v28 = vld [vmem:[%s2225_s4 + $0xd8] sm:$0xf0]  ;;  %v1503_v29 = vld [vmem:[%s2225_s4 + $0xa0] sm:$0xf] }
  0x2b   : > { %1025 = vmatpush.bf16.msra.mxu2 %v1877_v24  ;;  %v1488_v24 = vor.u32 %v1813_v18, %v1487_v17  ;;  %v1505_v32 = vld [vmem:[%s2225_s4 + $0xb0] sm:$0xf0]  ;;  %v1511_v33 = vld [vmem:[%s2225_s4 + $0xa8] sm:$0xf]  ;;  %v1818_v34 = vld [vmem:[%s2225_s4 + $0xb4] sm:$0xf0] }
  0x2c   : > { %v1512_v38 = vor.u32 %v1818_v34, %v1511_v33  ;;  %v1819_v43 = vld [vmem:[%s2225_s4 + $0xc4] sm:$0xf]  ;;  %v1521_v44 = vld [vmem:[%s2225_s4 + $0xd0] sm:$0xf0]  ;;  %v1527_v45 = vld [vmem:[%s2225_s4 + $0xc8] sm:$0xf] }
  0x2d   : > { %848 = vmatpush.bf16.msra.mxu0 %v1860_v25  ;;  %v1492_v25 = vor.u32 %v1811_v19, %v1489_v20  ;;  %v1822_v46 = vld [vmem:[%s2225_s4 + $0xd4] sm:$0xf0]  ;;  %v1524_v49 = vor.u32 %v1819_v43, %v1521_v44  ;;  %v1823_v55 = vld [vmem:[%s2225_s4 + $0xe4] sm:$0xf]  ;;  %v1537_v56 = vld [vmem:[%s2225_s4 + $0xf0] sm:$0xf0] }
  0x2e   : > { %937 = vmatpush.bf16.msra.mxu1 %v1868_v26  ;;  %v1496_v26 = vor.u32 %v1814_v22, %v1495_v21  ;;  %v1528_v50 = vor.u32 %v1822_v46, %v1527_v45  ;;  %v1543_v57 = vld [vmem:[%s2225_s4 + $0xe8] sm:$0xf]  ;;  %v1826_v58 = vld [vmem:[%s2225_s4 + $0xf4] sm:$0xf0]  ;;  %v1540_v61 = vor.u32 %v1823_v55, %v1537_v56  ;;  %v1829_v3 = vld [vmem:[%s2225_s4 + $0x10c] sm:$0xf0] }
  0x2f   : > { %1026 = vmatpush.bf16.msra.mxu2 %v1876_v27  ;;  %1774 = vmatmul.msk.bf16.gmra.mxu3 %vm789_vm1, %v1452_v39  ;;  %v1820_v27 = vld [vmem:[%s2225_s4 + $0xcc] sm:$0xf]  ;;  %v1544_v62 = vor.u32 %v1826_v58, %v1543_v57  ;;  %v1827_v4 = vld [vmem:[%s2225_s4 + $0x104] sm:$0xf]  ;;  %v1553_v5 = vld [vmem:[%s2225_s4 + $0x110] sm:$0xf0] }
  0x30   : > { %v1532_v35 = vor.u32 %v1820_v27, %v1529_v28  ;;  %v1824_v39 = vld [vmem:[%s2225_s4 + $0xec] sm:$0xf]  ;;  %v1559_v7 = vld [vmem:[%s2225_s4 + $0x108] sm:$0xf]  ;;  %v1830_v8 = vld [vmem:[%s2225_s4 + $0x114] sm:$0xf0] }
  0x31   : > { %849 = vmatpush.bf16.msra.mxu0 %v1859_v30  ;;  %v1817_v30 = vld [vmem:[%s2225_s4 + $0xac] sm:$0xf0]  ;;  %v1560_v15 = vor.u32 %v1830_v8, %v1559_v7  ;;  %v1831_v28 = vld [vmem:[%s2225_s4 + $0x124] sm:$0xf]  ;;  %v1609_v55 = vld [vmem:[%s2225_s4 + $0x178] sm:$0xf0] }
  0x32   : > { %938 = vmatpush.bf16.msra.mxu1 %v1867_v31  ;;  %v1815_v31 = vld [vmem:[%s2225_s4 + $0xa4] sm:$0xf]  ;;  %v1833_v27 = vld [vmem:[%s2225_s4 + $0x12c] sm:$0xf0]  ;;  %v1583_v56 = vld [vmem:[%s2225_s4 + $0x140] sm:$0xf] }
  0x33   : > { %1027 = vmatpush.bf16.msra.mxu2 %v1875_v36  ;;  %v1504_v36 = vor.u32 %v1817_v30, %v1503_v29  ;;  %v1508_v37 = vor.u32 %v1815_v31, %v1505_v32  ;;  %v1569_v29 = vld [vmem:[%s2225_s4 + $0x130] sm:$0xf0]  ;;  %v1575_v31 = vld [vmem:[%s2225_s4 + $0x128] sm:$0xf]  ;;  %v1834_v32 = vld [vmem:[%s2225_s4 + $0x134] sm:$0xf0] }
  0x34   : > { %850 = vmatmul.bf16.vlgmr.msra.gmra.mxu0 %v1424_v40  ;;  %v1545_v40 = vld [vmem:[%s2225_s4 + $0xf8] sm:$0xf0]  ;;  %v1837_v58 = vld [vmem:[%s2225_s4 + $0x14c] sm:$0xf0] }
  0x35   : > { %939 = vmatmul.bf16.vlgmr.msra.gmra.mxu1 %v1428_v41  ;;  %v1519_v41 = vld [vmem:[%s2225_s4 + $0xc0] sm:$0xf]  ;;  %v1548_v47 = vor.u32 %v1824_v39, %v1545_v40 }
  0x36   : > { %1028 = vmatmul.bf16.vlgmr.msra.gmra.mxu2 %v1432_v42  ;;  %v1821_v42 = vld [vmem:[%s2225_s4 + $0xcc] sm:$0xf0] }
  0x37   : > { %v1520_v48 = vor.u32 %v1821_v42, %v1519_v41  ;;  %v1576_v42 = vor.u32 %v1834_v32, %v1575_v31  ;;  %v1842_v31 = vld [vmem:[%s2225_s4 + $0x174] sm:$0xf0] }
  0x3f   : > { %1775 = vmatmul.msk.bf16.gmra.mxu3 %vm789_vm1, %v1468_v51  ;;  %v1828_v51 = vld [vmem:[%s2225_s4 + $0x10c] sm:$0xf] }
  0x44   : > { %855 = vmatmul.bf16.gmra.mxu0 %v1440_v52  ;;  %v1561_v52 = vld [vmem:[%s2225_s4 + $0x118] sm:$0xf0] }
  0x45   : > { %944 = vmatmul.bf16.gmra.mxu1 %v1444_v53  ;;  %v1535_v53 = vld [vmem:[%s2225_s4 + $0xe0] sm:$0xf]  ;;  %v1564_v59 = vor.u32 %v1828_v51, %v1561_v52 }
  0x46   : > { %1033 = vmatmul.bf16.gmra.mxu2 %v1448_v54  ;;  %v1825_v54 = vld [vmem:[%s2225_s4 + $0xec] sm:$0xf0] }
  0x47   : > { %v1536_v60 = vor.u32 %v1825_v54, %v1535_v53  ;;  %v1840_v54 = vld [vmem:[%s2225_s4 + $0x16c] sm:$0xf] }
  0x4f   : > { %1776 = vmatmul.msk.bf16.gmra.mxu3 %vm789_vm1, %v1484_v63 }
  0x54   : > { %860 = vmatmul.bf16.gmra.mxu0 %v1456_v0  ;;  %v1832_v0 = vld [vmem:[%s2225_s4 + $0x12c] sm:$0xf] }
  0x55   : > { %949 = vmatmul.bf16.gmra.mxu1 %v1460_v1  ;;  %v1577_v1 = vld [vmem:[%s2225_s4 + $0x138] sm:$0xf0] }
  0x56   : > { %1038 = vmatmul.bf16.gmra.mxu2 %v1464_v2  ;;  %v1551_v2 = vld [vmem:[%s2225_s4 + $0x100] sm:$0xf]  ;;  %v1580_v9 = vor.u32 %v1832_v0, %v1577_v1  ;;  %v1612_v0 = vor.u32 %v1840_v54, %v1609_v55  ;;  %v1641_v54 = vld [vmem:[%s2225_s4 + $0x1b8] sm:$0xf0] }
  0x57   : > { %v1552_v10 = vor.u32 %v1829_v3, %v1551_v2  ;;  %v1584_v3 = vor.u32 %v1837_v58, %v1583_v56  ;;  %v1615_v55 = vld [vmem:[%s2225_s4 + $0x180] sm:$0xf]  ;;  %v1843_v58 = vld [vmem:[%s2225_s4 + $0x184] sm:$0xf] }
  0x5f   : > { %1777 = vmatmul.msk.bf16.gmra.mxu3 %vm789_vm1, %v1500_v11  ;;  %v1556_v11 = vor.u32 %v1827_v4, %v1553_v5 }
  0x64   : > { %865 = vmatmul.bf16.gmra.mxu0 %v1472_v12  ;;  %v2361_v12 = vld [vmem:[%s2518_s2] ss:$0 sm:$0xff] }
  0x65   : > { %954 = vmatmul.bf16.gmra.mxu1 %v1476_v13 }
  0x66   : > { %1043 = vmatmul.bf16.gmra.mxu2 %v1480_v14 }
  0x6f   : > { %1778 = vmatmul.msk.bf16.gmra.mxu3 %vm789_vm1, %v1516_v23  ;;  %v1836_v23 = vld [vmem:[%s2225_s4 + $0x14c] sm:$0xf] }
  0x74   : > { %870 = vmatmul.bf16.gmra.mxu0 %v1488_v24  ;;  %v1593_v24 = vld [vmem:[%s2225_s4 + $0x158] sm:$0xf0] }
  0x75   : > { %959 = vmatmul.bf16.gmra.mxu1 %v1492_v25  ;;  %v1567_v25 = vld [vmem:[%s2225_s4 + $0x120] sm:$0xf]  ;;  %v1596_v33 = vor.u32 %v1836_v23, %v1593_v24  ;;  %v1625_v23 = vld [vmem:[%s2225_s4 + $0x198] sm:$0xf0] }
  0x76   : > { %1048 = vmatmul.bf16.gmra.mxu2 %v1496_v26  ;;  %v1599_v24 = vld [vmem:[%s2225_s4 + $0x160] sm:$0xf] }
  0x7f   : > { %1779 = vmatmul.msk.bf16.gmra.mxu3 %vm789_vm1, %v1532_v35 }
  0x84   : > { %875 = vmatmul.bf16.gmra.mxu0 %v1504_v36  ;;  %v1568_v36 = vor.u32 %v1833_v27, %v1567_v25  ;;  %v1839_v27 = vld [vmem:[%s2225_s4 + $0x164] sm:$0xf] }
  0x85   : > { %964 = vmatmul.bf16.gmra.mxu1 %v1508_v37  ;;  %v1572_v37 = vor.u32 %v1831_v28, %v1569_v29  ;;  %v1601_v28 = vld [vmem:[%s2225_s4 + $0x170] sm:$0xf0] }
  0x86   : > { %1053 = vmatmul.bf16.gmra.mxu2 %v1512_v38 }
  0x8f   : > { %1780 = vmatmul.msk.bf16.gmra.mxu3 %vm789_vm1, %v1548_v47 }
  0x94   : > { %880 = vmatmul.bf16.gmra.mxu0 %v1520_v48 }
  0x95   : > { %969 = vmatmul.bf16.gmra.mxu1 %v1524_v49 }
  0x96   : > { %1058 = vmatmul.bf16.gmra.mxu2 %v1528_v50 }
  0x9f   : > { %1781 = vmatmul.msk.bf16.gmra.mxu3 %vm789_vm1, %v1564_v59  ;;  %v1835_v59 = vld [vmem:[%s2225_s4 + $0x144] sm:$0xf] }
  0xa2   : > { %v1118_v63 = vpop.f32.mrf.mxu3 }
  0xa4   : > { %885 = vmatmul.bf16.gmra.mxu0 %v1536_v60  ;;  %v1585_v60 = vld [vmem:[%s2225_s4 + $0x150] sm:$0xf0] }
  0xa5   : > { %974 = vmatmul.bf16.gmra.mxu1 %v1540_v61  ;;  %v1588_v4 = vor.u32 %v1835_v59, %v1585_v60  ;;  %v1617_v59 = vld [vmem:[%s2225_s4 + $0x190] sm:$0xf0] }
  0xa6   : > { %1063 = vmatmul.bf16.gmra.mxu2 %v1544_v62  ;;  %v1591_v62 = vld [vmem:[%s2225_s4 + $0x148] sm:$0xf] }
  0xaa   : > { %v1120_v6 = vpop.f32.mrf.mxu3 }
  0xaf   : > { %1782 = vmatmul.msk.bf16.gmra.mxu3 %vm789_vm1, %v1580_v9 }
  0xb1   : > { %v851_v13 = vpop.f32.mrf.mxu0 }
  0xb2   : > { %v940_v14 = vpop.f32.mrf.mxu1  ;;  %v852_v16 = vadd.f32 %v2361_v12, %v851_v13  ;;  %v1123_v17 = vpop.f32.mrf.mxu3 }
  0xb4   : > { %890 = vmatmul.bf16.gmra.mxu0 %v1552_v10  ;;  %v941_v19 = vadd.f32 %v940_v14, %v852_v16 }
  0xb5   : > { %979 = vmatmul.bf16.gmra.mxu1 %v1556_v11 }
  0xb6   : > { %1068 = vmatmul.bf16.gmra.mxu2 %v1560_v15 }
  0xb9   : > { %v1029_v18 = vpop.f32.mrf.mxu2  ;;  %v853_v20 = vpop.f32.mrf.mxu0 }
  0xba   : > { %v942_v21 = vpop.f32.mrf.mxu1  ;;  %v854_v22 = vadd.f32 %v2361_v12, %v853_v20  ;;  %v1030_v26 = vadd.f32 %v1029_v18, %v941_v19  ;;  %v1125_v30 = vpop.f32.mrf.mxu3 }
  0xbc   : > { %v943_v34 = vadd.f32 %v942_v21, %v854_v22  ;;  %v1119_v38 = vadd.f32 %v1118_v63, %v1030_v26  ;;  %v1838_v63 = vld [vmem:[%s2225_s4 + $0x154] sm:$0xf0]  ;;  %v1844_v22 = vld [vmem:[%s2225_s4 + $0x18c] sm:$0xf]  ;;  %v1841_v26 = vld [vmem:[%s2225_s4 + $0x16c] sm:$0xf0] }
  0xbd   : > { %v1592_v9 = vor.u32 %v1838_v63, %v1591_v62  ;;  %v1628_v32 = vor.u32 %v1844_v22, %v1625_v23  ;;  %v1846_v62 = vld [vmem:[%s2225_s4 + $0x194] sm:$0xf0]  ;;  %v1657_v22 = vld [vmem:[%s2225_s4 + $0x1d8] sm:$0xf0]  ;;  %v1631_v23 = vld [vmem:[%s2225_s4 + $0x1a0] sm:$0xf] }
  0xbe   : > { %v1198_v44 = vmax.f32 %v1119_v38, 0.0 }
  0xbf   : > { %1783 = vmatmul.msk.bf16.gmra.mxu3 %vm789_vm1, %v1596_v33 }
  0xc1   : > { %v1031_v35 = vpop.f32.mrf.mxu2  ;;  %v856_v40 = vpop.f32.mrf.mxu0 }
  0xc2   : > { %v1032_v39 = vadd.f32 %v1031_v35, %v943_v34  ;;  %v945_v41 = vpop.f32.mrf.mxu1  ;;  %v857_v46 = vadd.f32 %v2361_v12, %v856_v40  ;;  %v1128_v47 = vpop.f32.mrf.mxu3  ;;  %v1600_v35 = vor.u32 %v1841_v26, %v1599_v24  ;;  %v1847_v26 = vld [vmem:[%s2225_s4 + $0x1a4] sm:$0xf] }
  0xc4   : > { %v1121_v43 = vadd.f32 %v1120_v6, %v1032_v39  ;;  %895 = vmatmul.bf16.gmra.mxu0 %v1568_v36  ;;  %v946_v50 = vadd.f32 %v945_v41, %v857_v46  ;;  %v1604_v36 = vor.u32 %v1839_v27, %v1601_v28  ;;  %v1633_v27 = vld [vmem:[%s2225_s4 + $0x1b0] sm:$0xf0] }
  0xc5   : > { %984 = vmatmul.bf16.gmra.mxu1 %v1572_v37 }
  0xc6   : > { %v1199_v45 = vmax.f32 %v1121_v43, 0.0  ;;  %1073 = vmatmul.bf16.gmra.mxu2 %v1576_v42 }
  0xc8   : > { %v1887_v48 = vpack.c.bf16 %v1199_v45, %v1198_v44 }
  0xc9   : > { %v1034_v49 = vpop.f32.mrf.mxu2  ;;  %v858_v51 = vpop.f32.mrf.mxu0 }
  0xca   : > { %1888 = vst [vmem:[%s2379_s9] sm:$0xff] %v1887_v48   ;;  %v947_v52 = vpop.f32.mrf.mxu1  ;;  %v859_v53 = vadd.f32 %v2361_v12, %v858_v51  ;;  %v1035_v57 = vadd.f32 %v1034_v49, %v946_v50  ;;  %v1130_v61 = vpop.f32.mrf.mxu3 }
  0xcc   : > { %v948_v1 = vadd.f32 %v947_v52, %v859_v53  ;;  %v1124_v5 = vadd.f32 %v1123_v17, %v1035_v57  ;;  %v1848_v53 = vld [vmem:[%s2225_s4 + $0x1ac] sm:$0xf]  ;;  %v1845_v57 = vld [vmem:[%s2225_s4 + $0x18c] sm:$0xf0] }
  0xcd   : > { %v1644_v63 = vor.u32 %v1848_v53, %v1641_v54  ;;  %v1673_v53 = vld [vmem:[%s2225_s4 + $0x1f8] sm:$0xf0]  ;;  %v1647_v54 = vld [vmem:[%s2225_s4 + $0x1c0] sm:$0xf] }
  0xce   : > { %v1200_v11 = vmax.f32 %v1124_v5, 0.0 }
  0xcf   : > { %1784 = vmatmul.msk.bf16.gmra.mxu3 %vm789_vm1, %v1612_v0 }
  0xd1   : > { %v1036_v2 = vpop.f32.mrf.mxu2  ;;  %v861_v7 = vpop.f32.mrf.mxu0 }
  0xd2   : > { %v1037_v6 = vadd.f32 %v1036_v2, %v948_v1  ;;  %v950_v8 = vpop.f32.mrf.mxu1  ;;  %v862_v14 = vadd.f32 %v2361_v12, %v861_v7  ;;  %v1133_v15 = vpop.f32.mrf.mxu3  ;;  %v1616_v2 = vor.u32 %v1845_v57, %v1615_v55  ;;  %v1851_v57 = vld [vmem:[%s2225_s4 + $0x1c4] sm:$0xf] }
  0xd4   : > { %v1126_v10 = vadd.f32 %v1125_v30, %v1037_v6  ;;  %900 = vmatmul.bf16.gmra.mxu0 %v1584_v3  ;;  %v951_v18 = vadd.f32 %v950_v8, %v862_v14  ;;  %v1607_v30 = vld [vmem:[%s2225_s4 + $0x168] sm:$0xf]  ;;  %v1620_v3 = vor.u32 %v1843_v58, %v1617_v59  ;;  %v1649_v58 = vld [vmem:[%s2225_s4 + $0x1d0] sm:$0xf0] }
  0xd5   : > { %989 = vmatmul.bf16.gmra.mxu1 %v1588_v4  ;;  %v1608_v41 = vor.u32 %v1842_v31, %v1607_v30  ;;  %v1850_v30 = vld [vmem:[%s2225_s4 + $0x1b4] sm:$0xf0] }
  0xd6   : > { %v1201_v13 = vmax.f32 %v1126_v10, 0.0  ;;  %1078 = vmatmul.bf16.gmra.mxu2 %v1592_v9 }
  0xd8   : > { %v1892_v16 = vpack.c.bf16 %v1201_v13, %v1200_v11 }
  0xd9   : > { %v1039_v17 = vpop.f32.mrf.mxu2  ;;  %v863_v19 = vpop.f32.mrf.mxu0 }
  0xda   : > { %1964 = vst [vmem:[%s2379_s9 + $0x8] sm:$0xff] %v1892_v16   ;;  %v952_v20 = vpop.f32.mrf.mxu1  ;;  %v864_v21 = vadd.f32 %v2361_v12, %v863_v19  ;;  %v1040_v25 = vadd.f32 %v1039_v17, %v951_v18  ;;  %v1135_v29 = vpop.f32.mrf.mxu3 }
  0xdc   : > { %v953_v33 = vadd.f32 %v952_v20, %v864_v21  ;;  %v1129_v37 = vadd.f32 %v1128_v47, %v1040_v25  ;;  %v1852_v21 = vld [vmem:[%s2225_s4 + $0x1cc] sm:$0xf]  ;;  %v1849_v25 = vld [vmem:[%s2225_s4 + $0x1ac] sm:$0xf0] }
  0xdd   : > { %v1660_v31 = vor.u32 %v1852_v21, %v1657_v22  ;;  %v1857_v22 = vld [vmem:[%s2225_s4 + $0x1ec] sm:$0xf0] }
  0xde   : > { %v1202_v43 = vmax.f32 %v1129_v37, 0.0 }
  0xdf   : > { %1785 = vmatmul.msk.bf16.gmra.mxu3 %vm789_vm1, %v1628_v32 }
  0xe1   : > { %v1041_v34 = vpop.f32.mrf.mxu2  ;;  %v866_v39 = vpop.f32.mrf.mxu0 }
  0xe2   : > { %v1042_v38 = vadd.f32 %v1041_v34, %v953_v33  ;;  %v955_v40 = vpop.f32.mrf.mxu1  ;;  %v867_v45 = vadd.f32 %v2361_v12, %v866_v39  ;;  %v1138_v46 = vpop.f32.mrf.mxu3  ;;  %v1632_v34 = vor.u32 %v1849_v25, %v1631_v23  ;;  %v1855_v23 = vld [vmem:[%s2225_s4 + $0x1e4] sm:$0xf] }
  0xe4   : > { %v1131_v42 = vadd.f32 %v1130_v61, %v1042_v38  ;;  %905 = vmatmul.bf16.gmra.mxu0 %v1600_v35  ;;  %v956_v49 = vadd.f32 %v955_v40, %v867_v45  ;;  %v1623_v61 = vld [vmem:[%s2225_s4 + $0x188] sm:$0xf]  ;;  %v1636_v35 = vor.u32 %v1847_v26, %v1633_v27  ;;  %v1858_v27 = vld [vmem:[%s2225_s4 + $0x1f4] sm:$0xf0] }
  0xe5   : > { %994 = vmatmul.bf16.gmra.mxu1 %v1604_v36  ;;  %v1624_v8 = vor.u32 %v1846_v62, %v1623_v61  ;;  %v1854_v61 = vld [vmem:[%s2225_s4 + $0x1d4] sm:$0xf0]  ;;  %v1671_v26 = vld [vmem:[%s2225_s4 + $0x1e8] sm:$0xf] }
  0xe6   : > { %v1203_v44 = vmax.f32 %v1131_v42, 0.0  ;;  %1083 = vmatmul.bf16.gmra.mxu2 %v1608_v41 }
  0xe8   : > { %v1897_v47 = vpack.c.bf16 %v1203_v44, %v1202_v43 }
  0xe9   : > { %v1044_v48 = vpop.f32.mrf.mxu2  ;;  %v868_v50 = vpop.f32.mrf.mxu0 }
  0xea   : > { %1965 = vst [vmem:[%s2379_s9 + $0x10] sm:$0xff] %v1897_v47   ;;  %v957_v51 = vpop.f32.mrf.mxu1  ;;  %v869_v52 = vadd.f32 %v2361_v12, %v868_v50  ;;  %v1045_v56 = vadd.f32 %v1044_v48, %v956_v49  ;;  %v1140_v60 = vpop.f32.mrf.mxu3 }
  0xec   : > { %v958_v0 = vadd.f32 %v957_v51, %v869_v52  ;;  %v1134_v4 = vadd.f32 %v1133_v15, %v1045_v56  ;;  %v1856_v52 = vld [vmem:[%s2225_s4 + $0x1ec] sm:$0xf]  ;;  %v1853_v56 = vld [vmem:[%s2225_s4 + $0x1cc] sm:$0xf0] }
  0xed   : > { %v1676_v62 = vor.u32 %v1856_v52, %v1673_v53 }
  0xee   : > { %v1204_v10 = vmax.f32 %v1134_v4, 0.0 }
  0xef   : > { %1786 = vmatmul.msk.bf16.gmra.mxu3 %vm789_vm1, %v1644_v63 }
  0xf1   : > { %v1046_v1 = vpop.f32.mrf.mxu2  ;;  %v871_v6 = vpop.f32.mrf.mxu0 }
  0xf2   : > { %v1047_v5 = vadd.f32 %v1046_v1, %v958_v0  ;;  %v960_v7 = vpop.f32.mrf.mxu1  ;;  %v872_v13 = vadd.f32 %v2361_v12, %v871_v6  ;;  %v1143_v14 = vpop.f32.mrf.mxu3  ;;  %v1648_v1 = vor.u32 %v1853_v56, %v1647_v54 }
  0xf4   : > { %v1136_v9 = vadd.f32 %v1135_v29, %v1047_v5  ;;  %910 = vmatmul.bf16.gmra.mxu0 %v1616_v2  ;;  %v961_v17 = vadd.f32 %v960_v7, %v872_v13  ;;  %v1639_v29 = vld [vmem:[%s2225_s4 + $0x1a8] sm:$0xf]  ;;  %v1652_v2 = vor.u32 %v1851_v57, %v1649_v58 }
  0xf5   : > { %999 = vmatmul.bf16.gmra.mxu1 %v1620_v3  ;;  %v1640_v40 = vor.u32 %v1850_v30, %v1639_v29 }
  0xf6   : > { %v1205_v11 = vmax.f32 %v1136_v9, 0.0  ;;  %1088 = vmatmul.bf16.gmra.mxu2 %v1624_v8 }
  0xf8   : > { %v1902_v15 = vpack.c.bf16 %v1205_v11, %v1204_v10 }
  0xf9   : > { %v1049_v16 = vpop.f32.mrf.mxu2  ;;  %v873_v18 = vpop.f32.mrf.mxu0 }
  0xfa   : > { %1966 = vst [vmem:[%s2379_s9 + $0x18] sm:$0xff] %v1902_v15   ;;  %v962_v19 = vpop.f32.mrf.mxu1  ;;  %v874_v20 = vadd.f32 %v2361_v12, %v873_v18  ;;  %v1050_v24 = vadd.f32 %v1049_v16, %v961_v17  ;;  %v1145_v28 = vpop.f32.mrf.mxu3 }
  0xfc   : > { %v963_v32 = vadd.f32 %v962_v19, %v874_v20  ;;  %v1139_v36 = vadd.f32 %v1138_v46, %v1050_v24  ;;  %v1663_v20 = vld [vmem:[%s2225_s4 + $0x1e0] sm:$0xf]  ;;  %v1665_v24 = vld [vmem:[%s2225_s4 + $0x1f0] sm:$0xf0] }
  0xfd   : > { %v1664_v30 = vor.u32 %v1857_v22, %v1663_v20 }
  0xfe   : > { %v1206_v42 = vmax.f32 %v1139_v36, 0.0  ;;  %v1672_v36 = vor.u32 %v1858_v27, %v1671_v26 }
  0xff   : > { %1787 = vmatmul.msk.bf16.gmra.mxu3 %vm789_vm1, %v1660_v31  ;;  %v1668_v31 = vor.u32 %v1855_v23, %v1665_v24 }
 0x101   : > { %v1051_v33 = vpop.f32.mrf.mxu2  ;;  %v876_v38 = vpop.f32.mrf.mxu0 }
 0x102   : > { %v1052_v37 = vadd.f32 %v1051_v33, %v963_v32  ;;  %v965_v39 = vpop.f32.mrf.mxu1  ;;  %v877_v44 = vadd.f32 %v2361_v12, %v876_v38  ;;  %v1148_v45 = vpop.f32.mrf.mxu3 }
 0x104   : > { %v1141_v41 = vadd.f32 %v1140_v60, %v1052_v37  ;;  %915 = vmatmul.bf16.gmra.mxu0 %v1632_v34  ;;  %v966_v48 = vadd.f32 %v965_v39, %v877_v44  ;;  %v1655_v60 = vld [vmem:[%s2225_s4 + $0x1c8] sm:$0xf]  ;;  %s1883_s4 = sshll.u32 %s2107_s15, 7  ;;  %s1295_s15 = scalar_lea.sflag [#allocation3], %s202_s7 }
 0x105   : > { %1004 = vmatmul.bf16.gmra.mxu1 %v1636_v35  ;;  %v1656_v7 = vor.u32 %v1854_v61, %v1655_v60  ;;  %s1307_s18 = scalar_lea.hbm %s2519_s3, %s1883_s4 }
 0x106   : > { %v1207_v43 = vmax.f32 %v1141_v41, 0.0  ;;  %1093 = vmatmul.bf16.gmra.mxu2 %v1640_v40  ;;  %s1310_s21 = sshll.u32 %s1307_s18, 4  ;;  %s1311_s21 = int_to_ptr.hbm [resolvable:$true] %s1310_s21 }
 0x107   : > { %s2051_s23 = sshra.s32 %s1311_s21, 4  ;;  %s2052_s23 = int_to_ptr.hbm [resolvable:$true] %s2051_s23 }
 0x108   : > { %v1907_v46 = vpack.c.bf16 %v1207_v43, %v1206_v42  ;;  %s2053_s26 = scalar_lea.hbm %s2052_s23, 128  ;;  %p2058_p1 = scmp.lt.s32.totalorder %s2052_s23, %s2519_s3 }
 0x109   : > { %v1054_v47 = vpop.f32.mrf.mxu2  ;;  %v878_v49 = vpop.f32.mrf.mxu0  ;;  %p2054_p12 = scmp.ne.s32.totalorder %s2052_s23, %s2053_s26  ;;  %p2059_p2 = scmp.lt.s32.totalorder %s2057_s29, %s2053_s26 }
 0x10a   : > { %1967 = vst [vmem:[%s2379_s9 + $0x20] sm:$0xff] %v1907_v46   ;;  %v967_v50 = vpop.f32.mrf.mxu1  ;;  %v879_v51 = vadd.f32 %v2361_v12, %v878_v49  ;;  %v1055_v55 = vadd.f32 %v1054_v47, %v966_v48  ;;  %v1150_v59 = vpop.f32.mrf.mxu3 }
 0x10b   : > { %p2055_p13 = pnand %p2054_p12, %p2179_p4  ;;  %p2060_p3 = por %p2059_p2, %p2058_p1 }
 0x10c   : > { %v968_v63 = vadd.f32 %v967_v50, %v879_v51  ;;  %v1144_v3 = vadd.f32 %v1143_v14, %v1055_v55 }
 0x10d   : > { %p2056_p0 = pneg %p2055_p13 }
 0x10e   : > { %v1208_v9 = vmax.f32 %v1144_v3, 0.0 }
 0x10f   : > { %1788 = vmatmul.msk.bf16.gmra.mxu3 %vm789_vm1, %v1676_v62  ;;  %p2061_p5 = pnand %p2060_p3, %p2056_p0 }
 0x111   : > { %v1056_v0 = vpop.f32.mrf.mxu2  ;;  %v881_v5 = vpop.f32.mrf.mxu0 }
 0x112   : > { %v1057_v4 = vadd.f32 %v1056_v0, %v968_v63  ;;  %v970_v6 = vpop.f32.mrf.mxu1  ;;  %v882_v11 = vadd.f32 %v2361_v12, %v881_v5  ;;  %v1153_v13 = vpop.f32.mrf.mxu3 }
 0x114   : > { %v1146_v8 = vadd.f32 %v1145_v28, %v1057_v4  ;;  %920 = vmatmul.bf16.gmra.mxu0 %v1648_v1  ;;  %v971_v16 = vadd.f32 %v970_v6, %v882_v11 }
 0x115   : > { %1009 = vmatmul.bf16.gmra.mxu1 %v1652_v2 }
 0x116   : > { %v1209_v10 = vmax.f32 %v1146_v8, 0.0  ;;  %1098 = vmatmul.bf16.gmra.mxu2 %v1656_v7 }
 0x118   : > { %v1912_v14 = vpack.c.bf16 %v1209_v10, %v1208_v9 }
 0x119   : > { %v1059_v15 = vpop.f32.mrf.mxu2  ;;  %v883_v17 = vpop.f32.mrf.mxu0 }
 0x11a   : > { %1968 = vst [vmem:[%s2379_s9 + $0x28] sm:$0xff] %v1912_v14   ;;  %v972_v18 = vpop.f32.mrf.mxu1  ;;  %v884_v19 = vadd.f32 %v2361_v12, %v883_v17  ;;  %v1060_v21 = vadd.f32 %v1059_v15, %v971_v16  ;;  %v1155_v25 = vpop.f32.mrf.mxu3 }
 0x11c   : > { %v973_v28 = vadd.f32 %v972_v18, %v884_v19  ;;  %v1149_v32 = vadd.f32 %v1148_v45, %v1060_v21 }
 0x11e   : > { %v1210_v38 = vmax.f32 %v1149_v32, 0.0 }
 0x121   : > { %v1061_v29 = vpop.f32.mrf.mxu2  ;;  %v886_v34 = vpop.f32.mrf.mxu0 }
 0x122   : > { %v1062_v33 = vadd.f32 %v1061_v29, %v973_v28  ;;  %v975_v35 = vpop.f32.mrf.mxu1  ;;  %v887_v40 = vadd.f32 %v2361_v12, %v886_v34  ;;  %v1158_v41 = vpop.f32.mrf.mxu3 }
 0x124   : > { %v1151_v37 = vadd.f32 %v1150_v59, %v1062_v33  ;;  %925 = vmatmul.bf16.gmra.mxu0 %v1664_v30  ;;  %v976_v44 = vadd.f32 %v975_v35, %v887_v40 }
 0x125   : > { %1014 = vmatmul.bf16.gmra.mxu1 %v1668_v31 }
 0x126   : > { %v1211_v39 = vmax.f32 %v1151_v37, 0.0  ;;  %1103 = vmatmul.bf16.gmra.mxu2 %v1672_v36 }
 0x128   : > { %v1917_v42 = vpack.c.bf16 %v1211_v39, %v1210_v38 }
 0x129   : > { %v1064_v43 = vpop.f32.mrf.mxu2  ;;  %v888_v46 = vpop.f32.mrf.mxu0 }
 0x12a   : > { %1969 = vst [vmem:[%s2379_s9 + $0x30] sm:$0xff] %v1917_v42   ;;  %v977_v47 = vpop.f32.mrf.mxu1  ;;  %v889_v45 = vadd.f32 %v2361_v12, %v888_v46  ;;  %v1065_v48 = vadd.f32 %v1064_v43, %v976_v44  ;;  %v1160_v49 = vpop.f32.mrf.mxu3 }
 0x12c   : > { %v978_v50 = vadd.f32 %v977_v47, %v889_v45  ;;  %v1154_v52 = vadd.f32 %v1153_v13, %v1065_v48 }
 0x12e   : > { %v1212_v57 = vmax.f32 %v1154_v52, 0.0 }
 0x131   : > { %v1066_v51 = vpop.f32.mrf.mxu2  ;;  %v891_v54 = vpop.f32.mrf.mxu0 }
 0x132   : > { %v1067_v53 = vadd.f32 %v1066_v51, %v978_v50  ;;  %v980_v55 = vpop.f32.mrf.mxu1  ;;  %v892_v59 = vadd.f32 %v2361_v12, %v891_v54  ;;  %v1163_v60 = vpop.f32.mrf.mxu3 }
 0x134   : > { %v1156_v56 = vadd.f32 %v1155_v25, %v1067_v53  ;;  %v981_v63 = vadd.f32 %v980_v55, %v892_v59 }
 0x136   : > { %v1213_v58 = vmax.f32 %v1156_v56, 0.0 }
 0x138   : > { %v1922_v61 = vpack.c.bf16 %v1213_v58, %v1212_v57 }
 0x139   : > { %v1069_v62 = vpop.f32.mrf.mxu2  ;;  %v893_v0 = vpop.f32.mrf.mxu0 }
 0x13a   : > { %1970 = vst [vmem:[%s2379_s9 + $0x38] sm:$0xff] %v1922_v61   ;;  %v982_v1 = vpop.f32.mrf.mxu1  ;;  %v894_v2 = vadd.f32 %v2361_v12, %v893_v0  ;;  %v1070_v3 = vadd.f32 %v1069_v62, %v981_v63  ;;  %v1165_v4 = vpop.f32.mrf.mxu3 }
 0x13c   : > { %v983_v5 = vadd.f32 %v982_v1, %v894_v2  ;;  %v1159_v7 = vadd.f32 %v1158_v41, %v1070_v3 }
 0x13e   : > { %v1214_v13 = vmax.f32 %v1159_v7, 0.0 }
 0x141   : > { %v1071_v6 = vpop.f32.mrf.mxu2  ;;  %v896_v9 = vpop.f32.mrf.mxu0 }
 0x142   : > { %v1072_v8 = vadd.f32 %v1071_v6, %v983_v5  ;;  %v985_v10 = vpop.f32.mrf.mxu1  ;;  %v897_v15 = vadd.f32 %v2361_v12, %v896_v9  ;;  %v1168_v16 = vpop.f32.mrf.mxu3 }
 0x144   : > { %v1161_v11 = vadd.f32 %v1160_v49, %v1072_v8  ;;  %v986_v19 = vadd.f32 %v985_v10, %v897_v15 }
 0x146   : > { %v1215_v14 = vmax.f32 %v1161_v11, 0.0 }
 0x148   : > { %v1927_v17 = vpack.c.bf16 %v1215_v14, %v1214_v13 }
 0x149   : > { %v1074_v18 = vpop.f32.mrf.mxu2  ;;  %v898_v20 = vpop.f32.mrf.mxu0 }
 0x14a   : > { %1971 = vst [vmem:[%s2379_s9 + $0x40] sm:$0xff] %v1927_v17   ;;  %v987_v21 = vpop.f32.mrf.mxu1  ;;  %v899_v22 = vadd.f32 %v2361_v12, %v898_v20  ;;  %v1075_v23 = vadd.f32 %v1074_v18, %v986_v19  ;;  %v1170_v24 = vpop.f32.mrf.mxu3 }
 0x14c   : > { %v988_v25 = vadd.f32 %v987_v21, %v899_v22  ;;  %v1164_v27 = vadd.f32 %v1163_v60, %v1075_v23 }
 0x14e   : > { %v1216_v32 = vmax.f32 %v1164_v27, 0.0 }
 0x151   : > { %v1076_v26 = vpop.f32.mrf.mxu2  ;;  %v901_v29 = vpop.f32.mrf.mxu0 }
 0x152   : > { %v1077_v28 = vadd.f32 %v1076_v26, %v988_v25  ;;  %v990_v30 = vpop.f32.mrf.mxu1  ;;  %v902_v34 = vadd.f32 %v2361_v12, %v901_v29  ;;  %v1173_v37 = vpop.f32.mrf.mxu3 }
 0x154   : > { %v1166_v31 = vadd.f32 %v1165_v4, %v1077_v28  ;;  %v991_v38 = vadd.f32 %v990_v30, %v902_v34 }
 0x156   : > { %v1217_v33 = vmax.f32 %v1166_v31, 0.0 }
 0x158   : > { %v1932_v35 = vpack.c.bf16 %v1217_v33, %v1216_v32 }
 0x159   : > { %v1079_v36 = vpop.f32.mrf.mxu2  ;;  %v903_v39 = vpop.f32.mrf.mxu0 }
 0x15a   : > { %1972 = vst [vmem:[%s2379_s9 + $0x48] sm:$0xff] %v1932_v35   ;;  %v992_v40 = vpop.f32.mrf.mxu1  ;;  %v904_v41 = vadd.f32 %v2361_v12, %v903_v39  ;;  %v1080_v42 = vadd.f32 %v1079_v36, %v991_v38  ;;  %v1175_v49 = vpop.f32.mrf.mxu3 }
 0x15c   : > { %v993_v43 = vadd.f32 %v992_v40, %v904_v41  ;;  %v1169_v46 = vadd.f32 %v1168_v16, %v1080_v42 }
 0x15e   : > { %v1218_v51 = vmax.f32 %v1169_v46, 0.0 }
 0x161   : > { %v1081_v44 = vpop.f32.mrf.mxu2  ;;  %v906_v45 = vpop.f32.mrf.mxu0 }
 0x162   : > { %v1082_v47 = vadd.f32 %v1081_v44, %v993_v43  ;;  %v995_v48 = vpop.f32.mrf.mxu1  ;;  %v907_v53 = vadd.f32 %v2361_v12, %v906_v45  ;;  %v1178_v60 = vpop.f32.mrf.mxu3 }
 0x164   : > { %v1171_v50 = vadd.f32 %v1170_v24, %v1082_v47  ;;  %v996_v56 = vadd.f32 %v995_v48, %v907_v53 }
 0x166   : > { %v1219_v52 = vmax.f32 %v1171_v50, 0.0 }
 0x168   : > { %v1937_v54 = vpack.c.bf16 %v1219_v52, %v1218_v51 }
 0x169   : > { %v1084_v55 = vpop.f32.mrf.mxu2  ;;  %v908_v57 = vpop.f32.mrf.mxu0 }
 0x16a   : > { %1973 = vst [vmem:[%s2379_s9 + $0x50] sm:$0xff] %v1937_v54   ;;  %v997_v58 = vpop.f32.mrf.mxu1  ;;  %v909_v59 = vadd.f32 %v2361_v12, %v908_v57  ;;  %v1085_v61 = vadd.f32 %v1084_v55, %v996_v56  ;;  %v1180_v8 = vpop.f32.mrf.mxu3 }
 0x16c   : > { %v998_v62 = vadd.f32 %v997_v58, %v909_v59  ;;  %v1174_v0 = vadd.f32 %v1173_v37, %v1085_v61 }
 0x16e   : > { %v1220_v5 = vmax.f32 %v1174_v0, 0.0 }
 0x171   : > { %v1086_v63 = vpop.f32.mrf.mxu2  ;;  %v911_v2 = vpop.f32.mrf.mxu0 }
 0x172   : > { %v1087_v1 = vadd.f32 %v1086_v63, %v998_v62  ;;  %v1000_v3 = vpop.f32.mrf.mxu1  ;;  %v912_v7 = vadd.f32 %v2361_v12, %v911_v2  ;;  %v1183_v19 = vpop.f32.mrf.mxu3 }
 0x174   : > { %v1176_v4 = vadd.f32 %v1175_v49, %v1087_v1  ;;  %v1001_v11 = vadd.f32 %v1000_v3, %v912_v7 }
 0x176   : > { %v1221_v6 = vmax.f32 %v1176_v4, 0.0 }
 0x178   : > { %v1942_v9 = vpack.c.bf16 %v1221_v6, %v1220_v5 }
 0x179   : > { %v1089_v10 = vpop.f32.mrf.mxu2  ;;  %v913_v13 = vpop.f32.mrf.mxu0 }
 0x17a   : > { %1974 = vst [vmem:[%s2379_s9 + $0x58] sm:$0xff] %v1942_v9   ;;  %v1002_v14 = vpop.f32.mrf.mxu1  ;;  %v914_v15 = vadd.f32 %v2361_v12, %v913_v13  ;;  %v1090_v16 = vadd.f32 %v1089_v10, %v1001_v11  ;;  %v1185_v33 = vpop.f32.mrf.mxu3 }
 0x17c   : > { %v1003_v17 = vadd.f32 %v1002_v14, %v914_v15  ;;  %v1179_v20 = vadd.f32 %v1178_v60, %v1090_v16 }
 0x17e   : > { %v1222_v25 = vmax.f32 %v1179_v20, 0.0 }
 0x181   : > { %v1091_v18 = vpop.f32.mrf.mxu2  ;;  %v916_v22 = vpop.f32.mrf.mxu0 }
 0x182   : > { %v1092_v21 = vadd.f32 %v1091_v18, %v1003_v17  ;;  %v1005_v23 = vpop.f32.mrf.mxu1  ;;  %v917_v27 = vadd.f32 %v2361_v12, %v916_v22  ;;  %v1188_v43 = vpop.f32.mrf.mxu3 }
 0x184   : > { %v1181_v24 = vadd.f32 %v1180_v8, %v1092_v21  ;;  %v1006_v30 = vadd.f32 %v1005_v23, %v917_v27 }
 0x186   : > { %v1223_v26 = vmax.f32 %v1181_v24, 0.0 }
 0x188   : > { %v1947_v28 = vpack.c.bf16 %v1223_v26, %v1222_v25 }
 0x189   : > { %v1094_v29 = vpop.f32.mrf.mxu2  ;;  %v918_v31 = vpop.f32.mrf.mxu0 }
 0x18a   : > { %1975 = vst [vmem:[%s2379_s9 + $0x60] sm:$0xff] %v1947_v28   ;;  %v1007_v32 = vpop.f32.mrf.mxu1  ;;  %v919_v34 = vadd.f32 %v2361_v12, %v918_v31  ;;  %v1095_v35 = vadd.f32 %v1094_v29, %v1006_v30  ;;  %v1190_v54 = vpop.f32.mrf.mxu3 }
 0x18c   : > { %v1008_v36 = vadd.f32 %v1007_v32, %v919_v34  ;;  %v1184_v38 = vadd.f32 %v1183_v19, %v1095_v35 }
 0x18e   : > { %v1224_v44 = vmax.f32 %v1184_v38, 0.0 }
 0x191   : > { %v1096_v37 = vpop.f32.mrf.mxu2  ;;  %v921_v40 = vpop.f32.mrf.mxu0 }
 0x192   : > { %v1097_v39 = vadd.f32 %v1096_v37, %v1008_v36  ;;  %v1010_v41 = vpop.f32.mrf.mxu1  ;;  %v922_v47 = vadd.f32 %v2361_v12, %v921_v40  ;;  %v1193_v2 = vpop.f32.mrf.mxu3 }
 0x194   : > { %v1186_v42 = vadd.f32 %v1185_v33, %v1097_v39  ;;  %v1011_v49 = vadd.f32 %v1010_v41, %v922_v47 }
 0x196   : > { %v1225_v46 = vmax.f32 %v1186_v42, 0.0 }
 0x198   : > { %v1952_v45 = vpack.c.bf16 %v1225_v46, %v1224_v44 }
 0x199   : > { %v1099_v48 = vpop.f32.mrf.mxu2  ;;  %v923_v50 = vpop.f32.mrf.mxu0 }
 0x19a   : > { %1976 = vst [vmem:[%s2379_s9 + $0x68] sm:$0xff] %v1952_v45   ;;  %v1012_v51 = vpop.f32.mrf.mxu1  ;;  %v924_v52 = vadd.f32 %v2361_v12, %v923_v50  ;;  %v1100_v53 = vadd.f32 %v1099_v48, %v1011_v49  ;;  %v1195_v14 = vpop.f32.mrf.mxu3 }
 0x19c   : > { %v1013_v55 = vadd.f32 %v1012_v51, %v924_v52  ;;  %v1189_v57 = vadd.f32 %v1188_v43, %v1100_v53 }
 0x19e   : > { %v1226_v62 = vmax.f32 %v1189_v57, 0.0 }
 0x1a1   : > { %v1101_v56 = vpop.f32.mrf.mxu2  ;;  %v926_v59 = vpop.f32.mrf.mxu0 }
 0x1a2   : > { %v1102_v58 = vadd.f32 %v1101_v56, %v1013_v55  ;;  %v1015_v61 = vpop.f32.mrf.mxu1  ;;  %v927_v0 = vadd.f32 %v2361_v12, %v926_v59 }
 0x1a4   : > { %v1191_v60 = vadd.f32 %v1190_v54, %v1102_v58  ;;  %v1016_v4 = vadd.f32 %v1015_v61, %v927_v0 }
 0x1a6   : > { %v1227_v63 = vmax.f32 %v1191_v60, 0.0 }
 0x1a8   : > { %v1957_v1 = vpack.c.bf16 %v1227_v63, %v1226_v62 }
 0x1a9   : > { %v1104_v3 = vpop.f32.mrf.mxu2  ;;  %v928_v5 = vpop.f32.mrf.mxu0 }
 0x1aa   : > { %1977 = vst [vmem:[%s2379_s9 + $0x70] sm:$0xff] %v1957_v1   ;;  %v929_v6 = vadd.f32 %v2361_v12, %v928_v5  ;;  %v1105_v7 = vadd.f32 %v1104_v3, %v1016_v4  ;;  %v1017_v8 = vpop.f32.mrf.mxu1 }
 0x1ac   : > { %v1018_v9 = vadd.f32 %v1017_v8, %v929_v6  ;;  %v1194_v11 = vadd.f32 %v1193_v2, %v1105_v7 }
 0x1ae   : > { %v1228_v16 = vmax.f32 %v1194_v11, 0.0 }
 0x1b1   : > { %v1106_v10 = vpop.f32.mrf.mxu2 }
 0x1b2   : > { %v1107_v13 = vadd.f32 %v1106_v10, %v1018_v9 }
 0x1b4   : > { %v1196_v15 = vadd.f32 %v1195_v14, %v1107_v13 }
 0x1b6   : > { %v1229_v12 = vmax.f32 %v1196_v15, 0.0 }
 0x1b8   : > { %v1962_v17 = vpack.c.bf16 %v1229_v12, %v1228_v16 }
 0x1ba   : > { %1978 = vst [vmem:[%s2379_s9 + $0x78] sm:$0xff] %v1962_v17  }
 0x1bb   : > { %2064 = shalt.err (!%p2061_p5)
}
 0x1bc   : > { %s2117_s6 = smov 64   ;;  %s2118_s7 = smov 4  }
 0x1bd   : > { %1979 = dma.vmem_to_hbm [thread:$0]  (%p2179_p4), %s1309_s19, 2048, %s1311_s21, %s1295_s15, %s2117_s6, %s2117_s6, %s2118_s7  }
 0x1be PF: > { %p1985_p6 = scmp.ge.s32.totalorder %s2115_s17, 2  ;;  %s1325_s8 = sand.u32 1, %s2095_s12  }
 0x1bf   : > { %s1326_s9 = scalar_lea.sflag [#allocation3], %s1325_s8 }
 0x1c0   : > { %p1982_p7 = pnand %p1985_p6, %p2186_p8 }
 0x1c2   : > { %p1983_p9 = pneg %p1982_p7 }
 0x1c4   : > { %2090 = dma.done.wait (%p1983_p9), %s1326_s9, 2048  }
 0x1c5   : > { %2092 = vsyncadd (%p1983_p9), %s1326_s9, 4294965248  ;;  %s16_s17 = sadd.s32 1, %s2115_s17   ;;  %s2522_s12 = smov %s2099_s13 }
 0x1c6   : > { %p13_p10 = scmp.ge.s32.totalorder %s16_s17, 10   ;;  %s2523_s13 = smov %s2103_s14 }
 0x1c7   : > { %s2524_s14 = smov %s2192_s25  ;;  %s2525_s15 = smov %s2111_s16 }
 0x1c8   : > { %s2526_s16 = smov %s2528_s20  ;;  %15 = sbr.rel (!%p13_p10) target bundleno = 4 (0x4), region = 73 }
 0x1cd   :  { %1332 = vsyncpa [#allocation3], 1 }
 0x1ce   :  { %1334 = vsyncpa [#allocation3 + $0x1], 1 }

</bundles_post_ra>
